<compile_context>
chip_gen: v7x
topology: tpu7x:2x2x1
jax: 0.10.0
libtpu: 0.0.40
codegen_flags: <defaults>
</compile_context>

<pallas_src>
import functools

import jax
import jax.numpy as jnp
from jax.experimental import pallas as pl
from jax.experimental.pallas import tpu as pltpu

_SQRT1_2 = 0.7071067811865476  # 1/sqrt(2)


def _mlp_kernel(x_ref, w1_ref, b1_ref, w2_ref, b2_ref, o_ref, *, n_blk):
    # x_ref : (n_blk, C, t_hw)  channel-major tiles (spatial on lanes)
    # w1_ref: (hidden, C)   b1_ref: (hidden, 1)   [BN already folded in]
    # w2_ref: (out_c, hidden)  b2_ref: (out_c, 1)
    # o_ref : (n_blk, out_c, t_hw)
    w1 = w1_ref[...]
    b1 = b1_ref[...]
    w2 = w2_ref[...]
    b2 = b2_ref[...]
    # n_blk is small (<=16); a static unrolled loop keeps every matmul 2-D
    # (clean Mosaic lowering) while all n_blk images share one grid step /
    # one set of DMAs.
    for b in range(n_blk):
        x = x_ref[b].astype(jnp.float32)                               # (C, t_hw)
        # fc1 (1x1 conv == channel matmul) with BN folded in.
        h = jnp.dot(w1, x, preferred_element_type=jnp.float32) + b1    # (hidden, t_hw)
        # exact GELU (nn.GELU default): 0.5*h*(1+erf(h/sqrt(2)))
        h = 0.5 * h * (1.0 + jax.lax.erf(h * _SQRT1_2))
        # fc2 (1x1 conv == channel matmul) + bias.
        o = jnp.dot(w2, h, preferred_element_type=jnp.float32) + b2    # (out_c, t_hw)
        o_ref[b] = o.astype(o_ref.dtype)


def _round_up(x, m):
    return (x + m - 1) // m * m


def _largest_divisor_leq(n, cap):
    cap = max(1, min(n, cap))
    for d in range(cap, 0, -1):
        if n % d == 0:
            return d
    return 1


def _vmem_budget_bytes():
    """Generation-aware VMEM budget: half of physical VMEM (64 MiB max)."""
    phys = 128 * 1024 * 1024
    try:
        info = pltpu.get_tpu_info()
        phys = int(getattr(info, "vmem_capacity_bytes", phys))
    except Exception:
        pass
    return min(phys, 128 * 1024 * 1024) // 2   # 32 MiB on v7x, 64 MiB on v5e/v6e


def _choose_tiles(N, C, out_c, HW, act_bytes, vmem_budget, weight_bytes):
    """Pick (n_blk, t_hw) so each grid step moves big, VMEM-safe tiles."""
    sub = 8 if act_bytes >= 4 else 16                       # sublane padding
    per_pos = (_round_up(C, sub) + _round_up(out_c, sub)) * act_bytes
    avail = max(vmem_budget - 2 * weight_bytes - (4 << 20), 2 << 20)
    max_pos = max(128, avail // (2 * per_pos))              # double-buffered in+out

    # Spatial tile: full axis if it fits, else a big multiple of 128.
    cap_hw = 32768
    if HW <= min(cap_hw, max_pos):
        t_hw = HW
    else:
        t_hw = max(128, (min(cap_hw, max_pos) // 128) * 128)

    # Batch blocking: merge images per step (must divide N; cap unroll at 16).
    n_cap = int(min(N, max(1, max_pos // t_hw), 16))
    n_blk = _largest_divisor_leq(N, n_cap)

    # Megacore (v7x has 2 TCs): make sure grid has >= 2 points when possible.
    def grid_pts(nb, th):
        return (-(-N // nb)) * (-(-HW // th))

    if grid_pts(n_blk, t_hw) < 2:
        if N >= 2:
            n_blk = _largest_divisor_leq(N, max(1, n_blk // 2))
        if grid_pts(n_blk, t_hw) < 2 and t_hw == HW and HW >= 256:
            t_hw = max(128, (((HW + 1) // 2 + 127) // 128) * 128)

    return n_blk, t_hw


@functools.partial(jax.jit, static_argnames=("use_bf16",))
def mlp_forward(x_nchw, params, use_bf16=False):
    """Runs the Mlp forward pass. x_nchw: (N, C, H, W)."""
    N, C, H, W = x_nchw.shape
    w1, b1, w2, b2 = params["w1"], params["b1"], params["w2"], params["b2"]
    gamma, beta = params["bn_gamma"], params["bn_beta"]
    mean, var = params["bn_mean"], params["bn_var"]
    eps = 1e-5

    hidden = w1.shape[1]
    out_c = w2.shape[1]
    HW = H * W

    act_dtype = jnp.bfloat16 if use_bf16 else jnp.float32
    act_bytes = 2 if use_bf16 else 4

    # Fold eval-mode BN into fc1 (tiny parameter-only ops, done once under jit).
    scale = gamma / jnp.sqrt(var + eps)                      # (C,)
    shift = beta - mean * scale                              # (C,)
    w1f = (w1.T * scale[None, :]).astype(jnp.float32)        # (hidden, C)
    b1f = (w1.T @ shift + b1).reshape(hidden, 1).astype(jnp.float32)
    w2t = w2.T.astype(jnp.float32)                           # (out_c, hidden)
    b2f = b2.reshape(out_c, 1).astype(jnp.float32)

    weight_bytes = 4 * (hidden * C + hidden + out_c * hidden + out_c)

    # NCHW -> (N, C, HW): free reshape, no transpose. Spatial on the lane axis.
    x_flat = x_nchw.reshape(N, C, HW).astype(act_dtype)

    vmem_budget = _vmem_budget_bytes()
    n_blk, t_hw = _choose_tiles(N, C, out_c, HW, act_bytes, vmem_budget,
                                weight_bytes)
    grid = (pl.cdiv(N, n_blk), pl.cdiv(HW, t_hw))

    cost = pl.CostEstimate(
        flops=2 * (hidden * C + out_c * hidden) * N * HW,
        transcendentals=hidden * N * HW,
        bytes_accessed=(C + out_c) * N * HW * act_bytes + weight_bytes,
    )

    kernel = functools.partial(_mlp_kernel, n_blk=n_blk)

    out_flat = pl.pallas_call(
        kernel,
        out_shape=jax.ShapeDtypeStruct((N, out_c, HW), act_dtype),
        grid_spec=pltpu.PrefetchScalarGridSpec(
            num_scalar_prefetch=0,
            grid=grid,
            in_specs=[
                # activations: (n_blk, C, t_hw) tile per grid step
                pl.BlockSpec((n_blk, C, t_hw), lambda n, i: (n, 0, i)),
                pl.BlockSpec((hidden, C), lambda n, i: (0, 0)),      # w1 (folded)
                pl.BlockSpec((hidden, 1), lambda n, i: (0, 0)),      # b1 (folded)
                pl.BlockSpec((out_c, hidden), lambda n, i: (0, 0)),  # w2^T
                pl.BlockSpec((out_c, 1), lambda n, i: (0, 0)),       # b2
            ],
            out_specs=pl.BlockSpec((n_blk, out_c, t_hw), lambda n, i: (n, 0, i)),
        ),
        compiler_params=pltpu.CompilerParams(
            dimension_semantics=("parallel", "parallel"),
            vmem_limit_bytes=int(vmem_budget),
        ),
        cost_estimate=cost,
    )(x_flat, w1f, b1f, w2t, b2f)

    # (N, Cout, HW) -> NCHW: free reshape.
    return out_flat.reshape(N, out_c, H, W)


def init_params(key, in_features, hidden_features, out_features):
    """Deterministic parameter init matching the module's __init__ shapes.

    Conv2d(ci, co, 1) weight (co, ci, 1, 1) is stored here as (ci, co);
    trunc_normal_(std=0.02), bias = 0. BatchNorm2d params are given
    non-trivial deterministic values so the BN branch actually does work.
    """
    k1, k2, k3, k4, k5, k6 = jax.random.split(key, 6)
    w1 = 0.02 * jax.random.truncated_normal(
        k1, -2.0, 2.0, (in_features, hidden_features), jnp.float32)
    b1 = jnp.zeros((hidden_features,), jnp.float32)
    w2 = 0.02 * jax.random.truncated_normal(
        k2, -2.0, 2.0, (hidden_features, out_features), jnp.float32)
    b2 = jnp.zeros((out_features,), jnp.float32)
    bn_gamma = 1.0 + 0.1 * jax.random.normal(k3, (in_features,), jnp.float32)
    bn_beta = 0.1 * jax.random.normal(k4, (in_features,), jnp.float32)
    bn_mean = 0.1 * jax.random.normal(k5, (in_features,), jnp.float32)
    bn_var = jnp.abs(1.0 + 0.1 * jax.random.normal(k6, (in_features,),
                                                   jnp.float32))
    return dict(w1=w1, b1=b1, w2=w2, b2=b2, bn_gamma=bn_gamma, bn_beta=bn_beta,
                bn_mean=bn_mean, bn_var=bn_var)


def _reference(x_nchw, params, eps=1e-5):
    """Pure-JAX reference (unfolded BN) for correctness checking."""
    scale = params["bn_gamma"] / jnp.sqrt(params["bn_var"] + eps)
    shift = params["bn_beta"] - params["bn_mean"] * scale
    x = jnp.transpose(x_nchw, (0, 2, 3, 1))              # NHWC
    y = x * scale + shift
    h = jnp.einsum("nhwc,cd->nhwd", y, params["w1"]) + params["b1"]
    h = 0.5 * h * (1.0 + jax.lax.erf(h * _SQRT1_2))
    o = jnp.einsum("nhwd,de->nhwe", h, params["w2"]) + params["b2"]
    return jnp.transpose(o, (0, 3, 1, 2))                # NCHW


if __name__ == "__main__":
    key = jax.random.PRNGKey(0)
    kx, kp = jax.random.split(key)

    N, C, H, W = 2, 4, 16, 16          # in_features = 4
    hidden = 8                         # hidden_features
    out_c = C                          # out_features defaults to in_features

    x = jax.random.normal(kx, (N, C, H, W), jnp.float32)
    params = init_params(kp, C, hidden, out_c)

    out = jax.block_until_ready(mlp_forward(x, params))
    ref = _reference(x, params)
    assert out.shape == (N, out_c, H, W)
    assert jnp.allclose(out, ref, atol=1e-5, rtol=1e-5), "mismatch vs reference"

    # Second config exercises batch-blocking (n_blk > 1 in a single grid step).
    x2 = jax.random.normal(kx, (4, C, 32, 32), jnp.float32)
    out2 = jax.block_until_ready(mlp_forward(x2, params))
    ref2 = _reference(x2, params)
    assert jnp.allclose(out2, ref2, atol=1e-5, rtol=1e-5), "mismatch (config 2)"

    print("KERNEL_OK")
</pallas_src>

<mosaic_0001>
module attributes {stable_mosaic.version = 11 : i64} {
  func.func @_mlp_kernel(%arg0: i32, %arg1: i32, %arg2: memref<1x4x256xf32, #tpu.memory_space<vmem>>, %arg3: memref<8x4xf32, #tpu.memory_space<vmem>>, %arg4: memref<8x1xf32, #tpu.memory_space<vmem>>, %arg5: memref<4x8xf32, #tpu.memory_space<vmem>>, %arg6: memref<4x1xf32, #tpu.memory_space<vmem>>, %arg7: memref<1x4x256xf32, #tpu.memory_space<vmem>>) attributes {dimension_semantics = [#tpu.dimension_semantics<parallel>, #tpu.dimension_semantics<parallel>], iteration_bounds = array<i64: 2, 1>, scalar_prefetch = 0 : i64, scratch_operands = 0 : i64, tpu.core_type = #tpu.core_type<tc>, window_params = [{transform_indices = @transform_0, window_bounds = array<i64: 1, 4, 256>}, {pipeline_mode = #tpu.pipeline_mode<synchronous>, transform_indices = @transform_1, window_bounds = array<i64: 8, 4>}, {pipeline_mode = #tpu.pipeline_mode<synchronous>, transform_indices = @transform_2, window_bounds = array<i64: 8, 1>}, {pipeline_mode = #tpu.pipeline_mode<synchronous>, transform_indices = @transform_3, window_bounds = array<i64: 4, 8>}, {pipeline_mode = #tpu.pipeline_mode<synchronous>, transform_indices = @transform_4, window_bounds = array<i64: 4, 1>}, {transform_indices = @transform_5, window_bounds = array<i64: 1, 4, 256>}]} {
    %c0 = arith.constant 0 : index
    %c0_0 = arith.constant 0 : index
    %0 = vector.load %arg3[%c0, %c0_0] : memref<8x4xf32, #tpu.memory_space<vmem>>, vector<8x4xf32>
    %c0_1 = arith.constant 0 : index
    %c0_2 = arith.constant 0 : index
    %1 = vector.load %arg4[%c0_1, %c0_2] : memref<8x1xf32, #tpu.memory_space<vmem>>, vector<8x1xf32>
    %c0_3 = arith.constant 0 : index
    %c0_4 = arith.constant 0 : index
    %2 = vector.load %arg5[%c0_3, %c0_4] : memref<4x8xf32, #tpu.memory_space<vmem>>, vector<4x8xf32>
    %c0_5 = arith.constant 0 : index
    %c0_6 = arith.constant 0 : index
    %3 = vector.load %arg6[%c0_5, %c0_6] : memref<4x1xf32, #tpu.memory_space<vmem>>, vector<4x1xf32>
    %c0_7 = arith.constant 0 : index
    %c0_8 = arith.constant 0 : index
    %c0_9 = arith.constant 0 : index
    %4 = vector.load %arg2[%c0_7, %c0_8, %c0_9] : memref<1x4x256xf32, #tpu.memory_space<vmem>>, vector<1x4x256xf32>
    %5 = vector.shape_cast %4 : vector<1x4x256xf32> to vector<4x256xf32>
    %cst = arith.constant dense<0.000000e+00> : vector<8x256xf32>
    %6 = tpu.matmul %0, %5, %cst {dimension_numbers = #tpu.dot_dimension_numbers<[1], [0], [0], [1], [0, 0, 1, 1], [], []>} : vector<8x4xf32>, vector<4x256xf32>, vector<8x256xf32> -> vector<8x256xf32>
    %7 = vector.broadcast %1 : vector<8x1xf32> to vector<8x256xf32>
    %8 = arith.addf %6, %7 : vector<8x256xf32>
    %cst_10 = arith.constant 5.000000e-01 : f32
    %9 = vector.broadcast %cst_10 : f32 to vector<8x256xf32>
    %10 = arith.mulf %9, %8 : vector<8x256xf32>
    %cst_11 = arith.constant 0.707106769 : f32
    %11 = vector.broadcast %cst_11 : f32 to vector<8x256xf32>
    %12 = arith.mulf %8, %11 : vector<8x256xf32>
    %13 = math.erf %12 : vector<8x256xf32>
    %cst_12 = arith.constant 1.000000e+00 : f32
    %14 = vector.broadcast %cst_12 : f32 to vector<8x256xf32>
    %15 = arith.addf %14, %13 : vector<8x256xf32>
    %16 = arith.mulf %10, %15 : vector<8x256xf32>
    %cst_13 = arith.constant dense<0.000000e+00> : vector<4x256xf32>
    %17 = tpu.matmul %2, %16, %cst_13 {dimension_numbers = #tpu.dot_dimension_numbers<[1], [0], [0], [1], [0, 0, 1, 1], [], []>} : vector<4x8xf32>, vector<8x256xf32>, vector<4x256xf32> -> vector<4x256xf32>
    %18 = vector.broadcast %3 : vector<4x1xf32> to vector<4x256xf32>
    %19 = arith.addf %17, %18 : vector<4x256xf32>
    %c0_14 = arith.constant 0 : index
    %c0_15 = arith.constant 0 : index
    %c0_16 = arith.constant 0 : index
    %20 = vector.load %arg7[%c0_14, %c0_15, %c0_16] : memref<1x4x256xf32, #tpu.memory_space<vmem>>, vector<1x4x256xf32>
    %21 = vector.shape_cast %20 : vector<1x4x256xf32> to vector<4x256xf32>
    %22 = vector.shape_cast %19 : vector<4x256xf32> to vector<1x4x256xf32>
    tpu.vector_store %arg7[%c0_14, %c0_15, %c0_16], %22 {strides = array<i32>} : memref<1x4x256xf32, #tpu.memory_space<vmem>>, vector<1x4x256xf32>,
    return
  }
  func.func @transform_0(%arg0: i32, %arg1: i32) -> (i32, i32, i32) {
    %c0_i32 = arith.constant 0 : i32
    %c0_i32_0 = arith.constant 0 : i32
    return %arg0, %c0_i32, %arg1 : i32, i32, i32
  }
  func.func @transform_1(%arg0: i32, %arg1: i32) -> (i32, i32) {
    %c0_i32 = arith.constant 0 : i32
    %c0_i32_0 = arith.constant 0 : i32
    %c0_i32_1 = arith.constant 0 : i32
    return %c0_i32, %c0_i32_0 : i32, i32
  }
  func.func @transform_2(%arg0: i32, %arg1: i32) -> (i32, i32) {
    %c0_i32 = arith.constant 0 : i32
    %c0_i32_0 = arith.constant 0 : i32
    %c0_i32_1 = arith.constant 0 : i32
    return %c0_i32, %c0_i32_0 : i32, i32
  }
  func.func @transform_3(%arg0: i32, %arg1: i32) -> (i32, i32) {
    %c0_i32 = arith.constant 0 : i32
    %c0_i32_0 = arith.constant 0 : i32
    %c0_i32_1 = arith.constant 0 : i32
    return %c0_i32, %c0_i32_0 : i32, i32
  }
  func.func @transform_4(%arg0: i32, %arg1: i32) -> (i32, i32) {
    %c0_i32 = arith.constant 0 : i32
    %c0_i32_0 = arith.constant 0 : i32
    %c0_i32_1 = arith.constant 0 : i32
    return %c0_i32, %c0_i32_0 : i32, i32
  }
  func.func @transform_5(%arg0: i32, %arg1: i32) -> (i32, i32, i32) {
    %c0_i32 = arith.constant 0 : i32
    %c0_i32_0 = arith.constant 0 : i32
    return %arg0, %c0_i32, %arg1 : i32, i32, i32
  }
}

</mosaic_0001>

<bundles_post_ra>
// kernel: mlp_forward.1
= control target key start
LH: loop header
LB: loop body
LE: loop exit
PB: predicated region body
PF: predicated region fallthrough
CT: control target
= control target key end

     0   :  { %10 = vsyncpa [#allocation3], 0  ;;  %s1345_s0 = inlined_call_operand.hbm [shape: f32[2,4,256], index: 0, kind: input, shape index: {}]   ;;  %s1346_s1 = inlined_call_operand.hbm [shape: f32[8,4], index: 1, kind: input, shape index: {}]   ;;  %s1347_s2 = inlined_call_operand.hbm [shape: f32[8,1], index: 2, kind: input, shape index: {}]   ;;  %s1348_s3 = inlined_call_operand.hbm [shape: f32[4,8], index: 3, kind: input, shape index: {}]   ;;  %s1349_s4 = inlined_call_operand.hbm [shape: f32[4,1], index: 4, kind: input, shape index: {}]   ;;  %s1350_s5 = inlined_call_operand.hbm [shape: f32[2,4,256], index: 5, kind: output, shape index: {}]  }
   0x1   :  { %12 = vsyncpa [#allocation3 + $0x1], 0 }
   0x2   :  { %13 = vsyncpa [#allocation6], 0 }
   0x3   :  { %14 = vsyncpa [#allocation9], 0 }
   0x4   :  { %15 = vsyncpa [#allocation4], 0 }
   0x5   :  { %17 = vsyncpa [#allocation4 + $0x1], 0  ;;  %s1049_s18 = smov 0   ;;  %s1051_s19 = smov 0  }
   0x6   :  { %s1053_s20 = smov 0   ;;  %s1055_s21 = smov 0  }
   0x7   :  { %s1057_s22 = smov 0   ;;  %s1059_s23 = smov 0  }
   0x8 LB: > { %s637_s24 = sadd.s32 4294967295, %s1009_s23   ;;  %p639_p0 = scmp.ge.s32.totalorder %s1009_s23, 1  ;;  %s1009_s23 = sphi %s1059_s23, %s23_s23   ;;  %s1005_s22 = sphi %s1057_s22, %s1374_s22   ;;  %s1001_s21 = sphi %s1055_s21, %s1373_s21   ;;  %s997_s20 = sphi %s1053_s20, %s1372_s20   ;;  %s993_s19 = sphi %s1051_s19, %s1371_s19   ;;  %s989_s18 = sphi %s1049_s18, %s1370_s18  }
   0x9   : > { %p1083_p1 = scmp.eq.s32.totalorder %s637_s24, 0  ;;  %p180_p2 = scmp.lt.s32.totalorder %s1009_s23, 3 }
   0xa   : > { %s1011_s27 = smov [#allocation5]   ;;  %s1012_s29 = smov [#allocation8]  }
   0xb   : > { %s1355_s25 = scalar_select %p1083_p1, 1, 0 }
   0xc   : > { %p1088_p3 = pnand %p639_p0, %p180_p2  ;;  %s193_s28 = sshll.u32 %s1011_s27, 4  ;;  %s194_s28 = int_to_ptr.vmem [resolvable:$true] %s193_s28 }
   0xd   : > { %s215_s30 = sshll.u32 %s1012_s29, 4  ;;  %s1013_s7 = smov [#allocation7]   ;;  %s1101_s30 = int_to_ptr.vmem [resolvable:$true] %s215_s30 }
   0xe   : > { %s1356_s26 = scalar_select %p1088_p3, 1, 0 }
   0xf   : > { %p686_p5 = pneg %p1088_p3  ;;  %s204_s8 = sshll.u32 %s1013_s7, 4  ;;  %s1103_s8 = int_to_ptr.vmem [resolvable:$true] %s204_s8 }
  0x10   : > { %s777_s11 = scalar_lea.hbm %s1346_s1, 128 }
  0x11   : > { %p1097_p6 = pnand %p686_p5, %p1083_p1  ;;  %p778_p7 = scmp.ne.s32.totalorder %s1346_s1, %s777_s11 }
  0x12   : > { %p784_p11 = scmp.lt.u32.totalorder %s777_s11, %s1346_s1 }
  0x13   : > { %p1113_p8 = pneg %p1097_p6 }
  0x15   : > { %p780_p9 = pnand %p1113_p8, %p778_p7 }
  0x17   : > { %p781_p10 = pneg %p780_p9 }
  0x19   : > { %p786_p12 = pnand %p784_p11, %p781_p10 }
  0x1b   : > { %789 = shalt.err (!%p786_p12)
}
  0x1c   : > { %s790_s17 = scalar_lea.vmem %s194_s28, 128  ;;  %p798_p5 = scmp.lt.s32.totalorder %s194_s28, %s194_s28 }
  0x1d   : > { %p791_p13 = scmp.ne.s32.totalorder %s194_s28, %s790_s17  ;;  %p799_p4 = scmp.lt.s32.totalorder %s790_s17, %s790_s17 }
  0x1f   : > { %p793_p0 = pnand %p791_p13, %p1113_p8  ;;  %p800_p3 = por %p799_p4, %p798_p5 }
  0x21   : > { %p794_p2 = pneg %p793_p0 }
  0x23   : > { %p801_p1 = pnand %p800_p3, %p794_p2 }
  0x25   : > { %804 = shalt.err (!%p801_p1)
}
  0x26   : > { %689 = dma.hbm_to_vmem [thread:$0]  (!%p1097_p6), %s1346_s1, 128, %s194_s28, [#allocation6]  }
  0x27   : > { %s805_s10 = scalar_lea.hbm %s1348_s3, 64 }
  0x28   : > { %p806_p7 = scmp.ne.s32.totalorder %s1348_s3, %s805_s10  ;;  %p812_p1 = scmp.lt.u32.totalorder %s805_s10, %s1348_s3 }
  0x2a   : > { %p808_p9 = pnand %p806_p7, %p1113_p8 }
  0x2c   : > { %p809_p4 = pneg %p808_p9 }
  0x2e   : > { %p814_p3 = pnand %p812_p1, %p809_p4 }
  0x30   : > { %817 = shalt.err (!%p814_p3)
}
  0x31   : > { %s818_s28 = scalar_lea.vmem %s1101_s30, 64  ;;  %p826_p13 = scmp.lt.s32.totalorder %s1101_s30, %s1101_s30 }
  0x32   : > { %p819_p10 = scmp.ne.s32.totalorder %s1101_s30, %s818_s28  ;;  %p827_p0 = scmp.lt.s32.totalorder %s818_s28, %s818_s28 }
  0x34   : > { %p821_p11 = pnand %p819_p10, %p1113_p8  ;;  %p828_p2 = por %p827_p0, %p826_p13 }
  0x36   : > { %p822_p12 = pneg %p821_p11 }
  0x38   : > { %p829_p5 = pnand %p828_p2, %p822_p12 }
  0x3a   : > { %832 = shalt.err (!%p829_p5)
}
  0x3b   : > { %695 = dma.hbm_to_vmem [thread:$0]  (!%p1097_p6), %s1348_s3, 64, %s1101_s30, [#allocation9]  }
  0x3c   : > { %s833_s7 = scalar_lea.hbm %s1347_s2, 128 }
  0x3d   : > { %p834_p7 = scmp.ne.s32.totalorder %s1347_s2, %s833_s7  ;;  %p840_p1 = scmp.lt.u32.totalorder %s833_s7, %s1347_s2 }
  0x3f   : > { %p836_p9 = pnand %p834_p7, %p1113_p8 }
  0x41   : > { %p837_p4 = pneg %p836_p9 }
  0x43   : > { %p842_p3 = pnand %p840_p1, %p837_p4 }
  0x45   : > { %845 = shalt.err (!%p842_p3)
}
  0x46   : > { %s846_s30 = scalar_lea.vmem %s1103_s8, 128  ;;  %p854_p13 = scmp.lt.s32.totalorder %s1103_s8, %s1103_s8 }
  0x47   : > { %p847_p10 = scmp.ne.s32.totalorder %s1103_s8, %s846_s30  ;;  %p855_p0 = scmp.lt.s32.totalorder %s846_s30, %s846_s30 }
  0x49   : > { %p849_p11 = pnand %p847_p10, %p1113_p8  ;;  %p856_p2 = por %p855_p0, %p854_p13 }
  0x4b   : > { %p850_p12 = pneg %p849_p11 }
  0x4d   : > { %p857_p5 = pnand %p856_p2, %p850_p12 }
  0x4f   : > { %860 = shalt.err (!%p857_p5)
}
  0x50   : > { %692 = dma.hbm_to_vmem [thread:$0]  (!%p1097_p6), %s1347_s2, 128, %s1103_s8, [#allocation6]  }
  0x51   : > { %s1014_s28 = smov [#allocation10]   ;;  %s861_s29 = scalar_lea.hbm %s1349_s4, 64 }
  0x52   : > { %s226_s16 = sshll.u32 %s1014_s28, 4  ;;  %p862_p7 = scmp.ne.s32.totalorder %s1349_s4, %s861_s29  ;;  %s227_s16 = int_to_ptr.vmem [resolvable:$true] %s226_s16 }
  0x53   : > { %p868_p1 = scmp.lt.u32.totalorder %s861_s29, %s1349_s4 }
  0x54   : > { %p864_p9 = pnand %p862_p7, %p1113_p8 }
  0x56   : > { %p865_p4 = pneg %p864_p9 }
  0x58   : > { %p870_p3 = pnand %p868_p1, %p865_p4 }
  0x5a   : > { %873 = shalt.err (!%p870_p3)
}
  0x5b   : > { %s874_s8 = scalar_lea.vmem %s227_s16, 64  ;;  %p882_p13 = scmp.lt.s32.totalorder %s227_s16, %s227_s16 }
  0x5c   : > { %p875_p10 = scmp.ne.s32.totalorder %s227_s16, %s874_s8  ;;  %p883_p0 = scmp.lt.s32.totalorder %s874_s8, %s874_s8 }
  0x5e   : > { %p877_p11 = pnand %p875_p10, %p1113_p8  ;;  %p884_p2 = por %p883_p0, %p882_p13 }
  0x60   : > { %p878_p12 = pneg %p877_p11 }
  0x62   : > { %p885_p5 = pnand %p884_p2, %p878_p12 }
  0x64   : > { %888 = shalt.err (!%p885_p5)
}
  0x65   : > { %698 = dma.hbm_to_vmem [thread:$0]  (!%p1097_p6), %s1349_s4, 64, %s227_s16, [#allocation9]  }
  0x66   : > { %s638_s14 = sadd.s32 4294967294, %s1009_s23   ;;  %s35_s13 = sadd.s32 1, %s1005_s22 }
  0x67   : > { %p37_p8 = scmp.ge.s32.totalorder %s35_s13, 2  ;;  %s44_s6 = sadd.s32 1, %s997_s20 }
  0x68   : > { %p51_p7 = scmp.ne.s32.totalorder %s997_s20, %s993_s19  ;;  %p52_p9 = scmp.eq.s32.totalorder %s1009_s23, 0 }
  0x69   : > { %s1376_s13 = smov (%p37_p8, %s35_s13), 0  ;;  %p57_p1 = scmp.ne.s32.totalorder %s993_s19, %s989_s18 }
  0x6a   : > { %p1201_p4 = por %p52_p9, %p51_p7  ;;  %s39_s28 = ssub.s32 %s1005_s22, %s1376_s13 }
  0x6b   : > { %p167_p6 = scmp.eq.s32.totalorder %s637_s24, 1  ;;  %p42_p3 = scmp.eq.s32.totalorder %s39_s28, 0 }
  0x6c   : > { %p1360_p10 = scmp.ne.s32.totalorder %s1355_s25, 0  ;;  %p173_p13 = scmp.eq.s32.totalorder %s638_s14, 1 }
  0x6d   : > { %p1217_p12 = por %p167_p6, %p51_p7  ;;  %p711_p2 = scmp.lt.s32.totalorder %s1009_s23, 2 }
  0x6e   : > { %p1213_p11 = por %p1360_p10, %p57_p1  ;;  %p1224_p0 = por %p173_p13, %p57_p1 }
  0x6f   : > { %s1362_s17 = scalar_select %p1217_p12, 1, 0 }
  0x70   : > { %s1222_s27 = scalar_select %p42_p3, %s997_s20, %s44_s6  }
  0x71   : > { %s1363_s29 = scalar_select %p1224_p0, 1, 0 }
  0x72   : > { %s237_s7 = sand.u32 1, %s997_s20   ;;  %s664_s24 = sshll.u32 %s1005_s22, 7 }
  0x73   : > { %s645_s9 = sshll.u32 %s237_s7, 3  ;;  %s1234_s8 = scalar_lea.hbm %s1345_s0, %s664_s24 }
  0x74   : > { %s241_s12 = scalar_lea.vmem [#allocation2], %s645_s9  ;;  %p1238_p5 = pnand %p711_p2, %p1201_p4 }
  0x75   : > { %s251_s30 = sshll.u32 %s241_s12, 4  ;;  %s238_s6 = scalar_lea.sflag [#allocation3], %s237_s7  ;;  %s1242_s30 = int_to_ptr.vmem [resolvable:$true] %s251_s30 }
  0x76   : > { %s889_s28 = scalar_lea.hbm %s1234_s8, 128  ;;  %p891_p7 = pneg %p1238_p5 }
  0x77   : > { %p890_p8 = scmp.ne.s32.totalorder %s1234_s8, %s889_s28  ;;  %s894_s15 = scalar_lea.hbm %s1345_s0, 256 }
  0x78   : > { %p895_p4 = scmp.lt.u32.totalorder %s1234_s8, %s1345_s0  ;;  %p896_p6 = scmp.lt.u32.totalorder %s894_s15, %s889_s28 }
  0x79   : > { %p892_p9 = pnand %p891_p7, %p890_p8  ;;  %p898_p10 = scmp.lt.u32.totalorder %s889_s28, %s1234_s8 }
  0x7a   : > { %p897_p3 = por %p896_p6, %p895_p4 }
  0x7b   : > { %p893_p1 = pneg %p892_p9 }
  0x7c   : > { %p899_p13 = por %p898_p10, %p897_p3 }
  0x7e   : > { %p900_p2 = pnand %p899_p13, %p893_p1 }
  0x80   : > { %903 = shalt.err (!%p900_p2)
}
  0x81   : > { %s904_s7 = scalar_lea.vmem %s1242_s30, 128  ;;  %s1015_s12 = smov [#allocation2]  }
  0x82   : > { %p905_p8 = scmp.ne.s32.totalorder %s1242_s30, %s904_s7  ;;  %s909_s24 = sshll.u32 %s1015_s12, 4  ;;  %s910_s24 = int_to_ptr.vmem [resolvable:$false] %s909_s24 }
  0x83   : > { %s911_s9 = scalar_lea.vmem %s910_s24, 256  ;;  %p912_p12 = scmp.lt.s32.totalorder %s1242_s30, %s910_s24 }
  0x84   : > { %p907_p9 = pnand %p905_p8, %p891_p7  ;;  %p913_p4 = scmp.lt.s32.totalorder %s911_s9, %s904_s7 }
  0x86   : > { %p908_p0 = pneg %p907_p9  ;;  %p914_p6 = por %p913_p4, %p912_p12 }
  0x88   : > { %p915_p3 = pnand %p914_p6, %p908_p0 }
  0x8a   : > { %918 = shalt.err (!%p915_p3)
}
  0x8b   : > { %702 = dma.hbm_to_vmem [thread:$0]  (!%p1238_p5), %s1234_s8, 128, %s1242_s30, %s238_s6  }
  0x8c   : > { %p1365_p1 = scmp.ne.s32.totalorder %s1356_s26, 0 }
  0x8d   : > { %s1272_s28 = sand.u32 (!%p1365_p1), 1, %s993_s19  }
  0x8e   : > { %260 = sbr.rel (%p1365_p1) target bundleno = 625 (0x271), region = 40  ;;  %s649_s15 = sshll.u32 (!%p1365_p1), %s1272_s28, 3 }
  0x8f   : > { %s263_s10 = scalar_lea.sflag (!%p1365_p1), [#allocation3], %s1272_s28  ;;  %s266_s11 = scalar_lea.vmem (!%p1365_p1), [#allocation2], %s649_s15 }
  0x95   : > { %972 = dma.done.wait (%p1213_p11), %s263_s10, 128  }
  0x96   : > { %974 = vsyncadd (%p1213_p11), %s263_s10, 4294967168  ;;  %p1366_p12 = scmp.ne.s32.totalorder %s1355_s25, 0 }
  0x98   : > { %976 = dma.done.wait (%p1366_p12), [#allocation6], 256  }
  0x99   : > { %978 = vsyncadd (%p1366_p12), [#allocation6], 4294967040 }
  0x9a   : > { %980 = dma.done.wait (%p1366_p12), [#allocation9], 128  }
  0x9b   : > { %982 = vsyncadd (%p1366_p12), [#allocation9], 4294967168  ;;  %v1016_v0 = vmov 0.0   ;;  %v1017_v1 = vmov 0   ;;  %v315_v2 = vld [vmem:[%s266_s11] sm:$0xff]  ;;  %vm327_vm0 = vcmask 1043456  }
  0x9c   : > { %396 = vmatprep.mubr.f32.mxu0 %v1016_v0  ;;  %771 = vset.pattern.permute.xlu0 %v1017_v1  ;;  %v312_v3 = vld [vmem:[#allocation7] sm:$0xff]  ;;  %v322_v4 = vcombine.high %v315_v2, %v315_v2  ;;  %v311_v5 = vld [vmem:[#allocation5] sm:$0xff]  ;;  %vm323_vm1 = vcmask 31744   ;;  %v314_v6 = vld [vmem:[#allocation10] sm:$0xf]  ;;  %vm418_vm2 = vcmask 64512  }
  0x9d   : > { %486 = vmatprep.mubr.f32.mxu1 %v1016_v0  ;;  %318 = vperm.xlu0 %771, %v312_v3   ;;  %v313_v22 = vld [vmem:[#allocation8] sm:$0xf]  ;;  %s665_s25 = sshll.u32 %s1001_s21, 7  ;;  %s308_s26 = scalar_lea.vmem [#allocation11], %s649_s15 }
  0x9e   : > { %655 = vmatprep.subr.msk.mxu0 %vm327_vm0, %v322_v4  ;;  %s515_s16 = sshll.u32 %s308_s26, 4  ;;  %s1296_s14 = scalar_lea.hbm %s1350_s5, %s665_s25  ;;  %s1298_s16 = int_to_ptr.vmem [resolvable:$true] %s515_s16 }
  0x9f   : > { %656 = vmatpush1.msk.msra.mxu0 %vm327_vm0, %v315_v2  ;;  %s499_s6 = scalar_lea.sflag [#allocation4], %s1272_s28  ;;  %s919_s7 = scalar_lea.vmem %s1298_s16, 128 }
  0xa0   : > { %657 = vmatmul.mubr.msk.f32.vlgmr.msra.gmra.mrb[0].mxu0 %vm323_vm1, %v311_v5  ;;  %p920_p11 = scmp.ne.s32.totalorder %s1298_s16, %s919_s7  ;;  %p1367_p0 = scmp.ne.s32.totalorder %s1362_s17, 0 }
  0xa1   : > { %415 = vperm.xlu0 %771, %v314_v6   ;;  %s1018_s21 = smov [#allocation11]  }
  0xa2   : > { %p921_p5 = pnand %p920_p11, %p1367_p0  ;;  %s923_s12 = sshll.u32 %s1018_s21, 4  ;;  %s924_s12 = int_to_ptr.vmem [resolvable:$false] %s923_s12 }
  0xa3   : > { %s925_s24 = scalar_lea.vmem %s924_s12, 256  ;;  %p926_p10 = scmp.lt.s32.totalorder %s1298_s16, %s924_s12 }
  0xa4   : > { %p922_p7 = pneg %p921_p5  ;;  %p927_p13 = scmp.lt.s32.totalorder %s925_s24, %s919_s7 }
  0xa6   : > { %p928_p2 = por %p927_p13, %p926_p10 }
  0xa8   : > { %p929_p8 = pnand %p928_p2, %p922_p7 }
 0x11c   : > { %v319_v7 = vpop.permute.xlu0 %318 }
 0x120   : > { %v416_v23 = vpop.permute.xlu0 %415 }
 0x173   : > { %v398_v8 = vpop.f32.mrb[0].mxu0 }
 0x174   : > { %v399_v9 = vadd.f32 %v398_v8, %v319_v7  ;;  %v400_v10 = vpop.f32.mrb[1].mxu0 }
 0x175   : > { %v401_v11 = vadd.f32 %v400_v10, %v319_v7 }
 0x176   : > { %v405_v12 = vmul.f32 0.70710677, %v399_v9  ;;  %v403_v19 = vmul.f32 0.5, %v399_v9 }
 0x177   : > { %v406_v13 = vmul.f32 0.70710677, %v401_v11  ;;  %v404_v17 = vmul.f32 0.5, %v401_v11 }
 0x178   : > { %773 = verf.f32 %v405_v12 }
 0x179   : > { %775 = verf.f32 %v406_v13 }
 0x182   : > { %v774_v14 = vpop.eup %773 }
 0x183   : > { %v776_v15 = vpop.eup %775  ;;  %v409_v16 = vadd.f32 1.0, %v774_v14 }
 0x184   : > { %v410_v18 = vadd.f32 1.0, %v776_v15 }
 0x185   : > { %v411_v21 = vmul.f32 %v409_v16, %v403_v19 }
 0x186   : > { %v412_v20 = vmul.f32 %v410_v18, %v404_v17 }
 0x188   : > { %422 = vmatprep.subr.mxu1 %v412_v20 }
 0x189   : > { %423 = vmatpush1.msra.mxu1 %v411_v21 }
 0x18a   : > { %658 = vmatmul.mubr.msk.f32.vlgmr.msra.gmra.mrb[0].mxu1 %vm418_vm2, %v313_v22 }
 0x25d   : > { %v488_v24 = vpop.f32.mrb[0].mxu1 }
 0x25e   : > { %v489_v25 = vadd.f32 %v488_v24, %v416_v23  ;;  %v490_v26 = vpop.f32.mrb[1].mxu1 }
 0x25f   : > { %v491_v27 = vadd.f32 %v490_v26, %v416_v23 }
 0x261   : > { %v495_v28 = vcombine.low %v489_v25, %v491_v27 }
 0x263   : > { %497 = vst [vmem:[%s308_s26] sm:$0xff] %v495_v28 }
 0x264   : > { %932 = shalt.err (!%p929_p8)
}
 0x265   : > { %s933_s9 = scalar_lea.hbm %s1296_s14, 128  ;;  %s937_s10 = scalar_lea.hbm %s1350_s5, 256 }
 0x266   : > { %p934_p9 = scmp.ne.s32.totalorder %s1296_s14, %s933_s9  ;;  %p938_p3 = scmp.lt.u32.totalorder %s1296_s14, %s1350_s5 }
 0x267   : > { %p939_p1 = scmp.lt.u32.totalorder %s937_s10, %s933_s9  ;;  %p941_p11 = scmp.lt.u32.totalorder %s933_s9, %s1296_s14 }
 0x268   : > { %p935_p4 = pnand %p934_p9, %p1367_p0 }
 0x269   : > { %p940_p12 = por %p939_p1, %p938_p3 }
 0x26a   : > { %p936_p6 = pneg %p935_p4 }
 0x26b   : > { %p942_p5 = por %p941_p11, %p940_p12 }
 0x26d   : > { %p943_p7 = pnand %p942_p5, %p936_p6 }
 0x26f   : > { %946 = shalt.err (!%p943_p7)
}
 0x270   : > { %684 = dma.vmem_to_hbm [thread:$0]  (%p1367_p0), %s1298_s16, 128, %s1296_s14, %s499_s6  }
 0x271 PF: > { %s527_s26 = sand.u32 1, %s989_s18   ;;  %p1368_p10 = scmp.ne.s32.totalorder %s1363_s29, 0 }
 0x272   : > { %p1369_p13 = scmp.ge.s32.totalorder %s1009_s23, 2  ;;  %s528_s8 = scalar_lea.sflag [#allocation4], %s527_s26 }
 0x274   : > { %p704_p2 = pnand %p1369_p13, %p1368_p10 }
 0x276   : > { %984 = dma.done.wait (!%p704_p2), %s528_s8, 128  }
 0x277   : > { %986 = vsyncadd (!%p704_p2), %s528_s8, 4294967168  ;;  %s23_s23 = sadd.s32 1, %s1009_s23   ;;  %s1370_s18 = smov %s993_s19 }
 0x278   : > { %p20_p8 = scmp.ge.s32.totalorder %s23_s23, 4   ;;  %s1371_s19 = smov %s997_s20 }
 0x279   : > { %s1372_s20 = smov %s1222_s27  ;;  %s1373_s21 = smov %s1005_s22 }
 0x27a   : > { %s1374_s22 = smov %s1376_s13  ;;  %22 = sbr.rel (!%p20_p8) target bundleno = 8 (0x8), region = 101 }
 0x281   :  { %533 = vsyncpa [#allocation3], 1 }
 0x282   :  { %535 = vsyncpa [#allocation3 + $0x1], 1 }
 0x283   :  { %536 = vsyncpa [#allocation6], 1 }
 0x284   :  { %537 = vsyncpa [#allocation9], 1 }
 0x285   :  { %538 = vsyncpa [#allocation4], 1 }
 0x286   :  { %540 = vsyncpa [#allocation4 + $0x1], 1 }

</bundles_post_ra>
